<compile_context>
chip_gen: v7x
topology: tpu7x:2x2x1
jax: 0.10.0
libtpu: 0.0.40
codegen_flags: <defaults>
</compile_context>

<pallas_src>
import functools

import jax
import jax.numpy as jnp
from jax.experimental import pallas as pl
from jax.experimental.pallas import tpu as pltpu

_LANE = 128


def _sublane(dtype) -> int:
    # Native packed sublane tile: f32 -> 8, bf16 -> 16, int8/fp8 -> 32.
    nbytes = jnp.dtype(dtype).itemsize
    return max(8, 32 // nbytes)


def _pick_block_rows(rows, d_pad, dtype, *, vmem_budget_bytes=32 * 1024 * 1024,
                     max_block_rows=1024):
    """Pick the largest row tile that fits the VMEM budget (double-buffered)."""
    sub = _sublane(dtype)
    in_bytes = jnp.dtype(dtype).itemsize
    # double-buffered (2 inputs + 1 output) tiles + ~3 live f32 temps / element
    per_row_bytes = d_pad * (6 * in_bytes + 3 * 4)
    br = min(max_block_rows, max(sub, vmem_budget_bytes // per_row_bytes))
    br = (br // sub) * sub

    rows_rounded = pl.cdiv(rows, sub) * sub
    br = min(br, rows_rounded)
    # Keep >= 2 grid steps when possible so v7x's two TensorCores both work.
    if pl.cdiv(rows_rounded, br) < 2 and rows_rounded >= 2 * sub:
        br = pl.cdiv(pl.cdiv(rows_rounded, 2), sub) * sub
    return max(sub, br)


def _rmsnorm_gate_kernel(x_ref, g_ref, w_ref, o_ref, *, eps, inv_dim):
    # All compute in f32 on the VPU; exp / reciprocal / rsqrt go to the EUP slot.
    x = x_ref[...].astype(jnp.float32)
    g = g_ref[...].astype(jnp.float32)
    w = w_ref[...].astype(jnp.float32)          # (1, Dp), broadcasts over rows

    # gate_pos == 'pre', gate_act == 'sigmoid':
    #   sigmoid(g) = 1 / (1 + exp(-g))   (exact reciprocal on the EUP)
    sig = pl.reciprocal(1.0 + jnp.exp(-g))
    xg = x * sig

    # Row reduction over the *logical* dim; padded lanes contribute zeros
    # because x was zero-padded, so sum-of-squares is exact. 1/D folded in.
    ss = jnp.sum(xg * xg, axis=-1, keepdims=True)
    inv = jax.lax.rsqrt(ss * inv_dim + eps)
    o_ref[...] = (xg * inv * w).astype(o_ref.dtype)


def rms_norm_fused_gate(x, gate, weight, *, eps=1e-5, block_rows=None,
                        vmem_limit_bytes=64 * 1024 * 1024):
    """x, gate: (B, T, D); weight: (D,). Returns same shape/dtype as x."""
    # TODO(synk): only gate_act='sigmoid', gate_pos='pre' (the module defaults)
    # are implemented.
    B, T, D = x.shape
    rows = B * T
    itemsize = jnp.dtype(x.dtype).itemsize

    x2 = x.reshape(rows, D)
    g2 = gate.reshape(rows, D)
    w2 = weight.reshape(1, D)

    # Pad the lane axis to a multiple of 128 so output stores are unmasked,
    # lane-dense vst. No-op (no copy) when D is already a multiple of 128.
    d_pad = pl.cdiv(D, _LANE) * _LANE
    if d_pad != D:
        lane_pad = d_pad - D
        x2 = jnp.pad(x2, ((0, 0), (0, lane_pad)))
        g2 = jnp.pad(g2, ((0, 0), (0, lane_pad)))
        w2 = jnp.pad(w2, ((0, 0), (0, lane_pad)))

    if block_rows is None:
        block_rows = _pick_block_rows(rows, d_pad, x.dtype)

    # Pad rows instead of asserting divisibility (zero rows are harmless:
    # they produce zero outputs which are sliced off).
    rows_pad = pl.cdiv(rows, block_rows) * block_rows
    if rows_pad != rows:
        x2 = jnp.pad(x2, ((0, rows_pad - rows), (0, 0)))
        g2 = jnp.pad(g2, ((0, rows_pad - rows), (0, 0)))

    grid = (rows_pad // block_rows,)

    cost = pl.CostEstimate(
        flops=6 * rows_pad * d_pad,
        transcendentals=2 * rows_pad * d_pad + rows_pad,
        bytes_accessed=3 * rows_pad * d_pad * itemsize + d_pad * itemsize,
    )

    out = pl.pallas_call(
        functools.partial(_rmsnorm_gate_kernel, eps=eps, inv_dim=1.0 / D),
        out_shape=jax.ShapeDtypeStruct((rows_pad, d_pad), x.dtype),
        grid_spec=pltpu.PrefetchScalarGridSpec(
            num_scalar_prefetch=0,
            grid=grid,
            in_specs=[
                pl.BlockSpec((block_rows, d_pad), lambda i: (i, 0)),
                pl.BlockSpec((block_rows, d_pad), lambda i: (i, 0)),
                # Constant block index => fetched once, not re-DMA'd per step.
                pl.BlockSpec((1, d_pad), lambda i: (0, 0)),
            ],
            out_specs=pl.BlockSpec((block_rows, d_pad), lambda i: (i, 0)),
        ),
        compiler_params=pltpu.CompilerParams(
            dimension_semantics=("parallel",),
            vmem_limit_bytes=vmem_limit_bytes,
        ),
        cost_estimate=cost,
    )(x2, g2, w2)

    return out[:rows, :D].reshape(B, T, D)


def _reference(x, gate, weight, eps=1e-5):
    xf = x.astype(jnp.float32)
    gf = gate.astype(jnp.float32)
    xg = xf * jax.nn.sigmoid(gf)
    ms = jnp.mean(xg * xg, axis=-1, keepdims=True)
    return (xg * jax.lax.rsqrt(ms + eps) * weight.astype(jnp.float32)).astype(x.dtype)


if __name__ == "__main__":
    key = jax.random.PRNGKey(0)
    kx, kg = jax.random.split(key)

    B, T, D = 2, 8, 32
    x = jax.random.normal(kx, (B, T, D), dtype=jnp.float32)
    gate = jax.random.normal(kg, (B, T, D), dtype=jnp.float32)
    # nn.init.ones_(self.weight)
    weight = jnp.ones((D,), dtype=jnp.float32)

    out = rms_norm_fused_gate(x, gate, weight, eps=1e-5)
    out = jax.block_until_ready(out)

    ref = _reference(x, gate, weight, eps=1e-5)
    assert out.shape == ref.shape and out.dtype == ref.dtype
    assert jnp.allclose(out, ref, atol=1e-5, rtol=1e-5), "mismatch vs reference"

    print("KERNEL_OK")
</pallas_src>

<mosaic_0001>
module attributes {stable_mosaic.version = 11 : i64} {
  func.func @_rmsnorm_gate_kernel(%arg0: i32, %arg1: memref<8x128xf32, #tpu.memory_space<vmem>>, %arg2: memref<8x128xf32, #tpu.memory_space<vmem>>, %arg3: memref<1x128xf32, #tpu.memory_space<vmem>>, %arg4: memref<8x128xf32, #tpu.memory_space<vmem>>) attributes {dimension_semantics = [#tpu.dimension_semantics<parallel>], iteration_bounds = array<i64: 2>, scalar_prefetch = 0 : i64, scratch_operands = 0 : i64, tpu.core_type = #tpu.core_type<tc>, window_params = [{transform_indices = @transform_0, window_bounds = array<i64: 8, 128>}, {transform_indices = @transform_1, window_bounds = array<i64: 8, 128>}, {pipeline_mode = #tpu.pipeline_mode<synchronous>, transform_indices = @transform_2, window_bounds = array<i64: 1, 128>}, {transform_indices = @transform_3, window_bounds = array<i64: 8, 128>}]} {
    %c0 = arith.constant 0 : index
    %c0_0 = arith.constant 0 : index
    %0 = vector.load %arg1[%c0, %c0_0] : memref<8x128xf32, #tpu.memory_space<vmem>>, vector<8x128xf32>
    %c0_1 = arith.constant 0 : index
    %c0_2 = arith.constant 0 : index
    %1 = vector.load %arg2[%c0_1, %c0_2] : memref<8x128xf32, #tpu.memory_space<vmem>>, vector<8x128xf32>
    %c0_3 = arith.constant 0 : index
    %c0_4 = arith.constant 0 : index
    %2 = vector.load %arg3[%c0_3, %c0_4] : memref<1x128xf32, #tpu.memory_space<vmem>>, vector<1x128xf32>
    %cst = arith.constant 0.000000e+00 : f32
    %3 = vector.broadcast %cst : f32 to vector<8x128xf32>
    %4 = arith.subf %3, %1 : vector<8x128xf32>
    %5 = math.exp %4 : vector<8x128xf32>
    %cst_5 = arith.constant 1.000000e+00 : f32
    %6 = vector.broadcast %cst_5 : f32 to vector<8x128xf32>
    %7 = arith.addf %6, %5 : vector<8x128xf32>
    %8 = tpu.reciprocal %7 : vector<8x128xf32> -> vector<8x128xf32>
    %9 = arith.mulf %0, %8 : vector<8x128xf32>
    %10 = arith.mulf %9, %9 : vector<8x128xf32>
    %cst_6 = arith.constant dense<0.000000e+00> : vector<8xf32>
    %11 = vector.multi_reduction <add>, %10, %cst_6 [1] : vector<8x128xf32> to vector<8xf32>
    %12 = vector.shape_cast %11 : vector<8xf32> to vector<8x1xf32>
    %cst_7 = arith.constant 3.125000e-02 : f32
    %13 = vector.broadcast %cst_7 : f32 to vector<8x1xf32>
    %14 = arith.mulf %12, %13 : vector<8x1xf32>
    %cst_8 = arith.constant 9.99999974E-6 : f32
    %15 = vector.broadcast %cst_8 : f32 to vector<8x1xf32>
    %16 = arith.addf %14, %15 : vector<8x1xf32>
    %17 = math.rsqrt %16 : vector<8x1xf32>
    %18 = vector.broadcast %17 : vector<8x1xf32> to vector<8x128xf32>
    %19 = arith.mulf %9, %18 : vector<8x128xf32>
    %20 = vector.broadcast %2 : vector<1x128xf32> to vector<8x128xf32>
    %21 = arith.mulf %19, %20 : vector<8x128xf32>
    %c0_9 = arith.constant 0 : index
    %c0_10 = arith.constant 0 : index
    %22 = vector.load %arg4[%c0_9, %c0_10] : memref<8x128xf32, #tpu.memory_space<vmem>>, vector<8x128xf32>
    tpu.vector_store %arg4[%c0_9, %c0_10], %21 {strides = array<i32>} : memref<8x128xf32, #tpu.memory_space<vmem>>, vector<8x128xf32>,
    return
  }
  func.func @transform_0(%arg0: i32) -> (i32, i32) {
    %c0_i32 = arith.constant 0 : i32
    %c0_i32_0 = arith.constant 0 : i32
    return %arg0, %c0_i32 : i32, i32
  }
  func.func @transform_1(%arg0: i32) -> (i32, i32) {
    %c0_i32 = arith.constant 0 : i32
    %c0_i32_0 = arith.constant 0 : i32
    return %arg0, %c0_i32 : i32, i32
  }
  func.func @transform_2(%arg0: i32) -> (i32, i32) {
    %c0_i32 = arith.constant 0 : i32
    %c0_i32_0 = arith.constant 0 : i32
    %c0_i32_1 = arith.constant 0 : i32
    return %c0_i32, %c0_i32_0 : i32, i32
  }
  func.func @transform_3(%arg0: i32) -> (i32, i32) {
    %c0_i32 = arith.constant 0 : i32
    %c0_i32_0 = arith.constant 0 : i32
    return %arg0, %c0_i32 : i32, i32
  }
}

</mosaic_0001>

<bundles_post_ra>
// kernel: tpu_custom_call.1
= control target key start
LH: loop header
LB: loop body
LE: loop exit
PB: predicated region body
PF: predicated region fallthrough
CT: control target
= control target key end

     0   :  { %8 = vsyncpa [#allocation3], 0  ;;  %s889_s0 = inlined_call_operand.hbm [shape: f32[16,128], index: 0, kind: input, shape index: {}]   ;;  %s890_s1 = inlined_call_operand.hbm [shape: f32[16,128], index: 1, kind: input, shape index: {}]   ;;  %s891_s2 = inlined_call_operand.hbm [shape: f32[1,128], index: 2, kind: input, shape index: {}]   ;;  %s892_s3 = inlined_call_operand.hbm [shape: f32[16,128], index: 3, kind: output, shape index: {}]  }
   0x1   :  { %10 = vsyncpa [#allocation3 + $0x1], 0 }
   0x2   :  { %11 = vsyncpa [#allocation6], 0 }
   0x3   :  { %13 = vsyncpa [#allocation6 + $0x1], 0 }
   0x4   :  { %14 = vsyncpa [#allocation4], 0 }
   0x5   :  { %16 = vsyncpa [#allocation4 + $0x1], 0  ;;  %s649_s12 = smov 0   ;;  %s651_s13 = smov 0  }
   0x6   :  { %s653_s14 = smov 0   ;;  %s655_s15 = smov 0  }
   0x7 LB: > { %s670_s16 = sadd.s32 4294967295, %s623_s15   ;;  %s375_s17 = sadd.s32 4294967294, %s623_s15   ;;  %s623_s15 = sphi %s655_s15, %s918_s15   ;;  %s619_s14 = sphi %s653_s14, %s917_s14   ;;  %s615_s13 = sphi %s651_s13, %s916_s13   ;;  %s611_s12 = sphi %s649_s12, %s915_s12  }
   0x8   : > { %p42_p0 = scmp.ne.s32.totalorder %s615_s13, %s611_s12  ;;  %p893_p1 = scmp.eq.s32.totalorder %s670_s16, 0 }
   0x9   : > { %p119_p3 = scmp.eq.s32.totalorder %s375_s17, 1  ;;  %p376_p5 = scmp.ge.s32.totalorder %s623_s15, 1 }
   0xa   : > { %p679_p4 = por %p893_p1, %p42_p0  ;;  %p126_p7 = scmp.lt.s32.totalorder %s623_s15, 3 }
   0xb   : > { %p684_p6 = por %p119_p3, %p42_p0  ;;  %s625_s21 = smov [#allocation7]  }
   0xc   : > { %s897_s18 = scalar_select %p679_p4, 1, 0 }
   0xd   : > { %s898_s19 = scalar_select %p684_p6, 1, 0 }
   0xe   : > { %p689_p8 = pnand %p376_p5, %p126_p7  ;;  %s139_s22 = sshll.u32 %s625_s21, 4  ;;  %s140_s22 = int_to_ptr.vmem [resolvable:$true] %s139_s22 }
   0xf   : > { %s697_s23 = sadd.s32 1, %s623_s15   ;;  %s29_s27 = sadd.s32 1, %s619_s14 }
  0x10   : > { %s899_s20 = scalar_select %p689_p8, 1, 0 }
  0x11   : > { %p403_p10 = pneg %p689_p8  ;;  %s26_s25 = ssub.s32 %s623_s15, %s697_s23 }
  0x12   : > { %p707_p12 = scmp.eq.s32.totalorder %s26_s25, 0  ;;  %s461_s30 = scalar_lea.hbm %s891_s2, 16 }
  0x13   : > { %p701_p11 = pnand %p403_p10, %p893_p1  ;;  %p462_p0 = scmp.ne.s32.totalorder %s891_s2, %s461_s30 }
  0x14   : > { %s901_s26 = scalar_select %p707_p12, 1, 0 }
  0x15   : > { %p463_p3 = pneg %p701_p11  ;;  %p468_p10 = scmp.lt.u32.totalorder %s461_s30, %s891_s2 }
  0x17   : > { %p464_p5 = pnand %p463_p3, %p462_p0 }
  0x19   : > { %p465_p7 = pneg %p464_p5 }
  0x1b   : > { %p470_p9 = pnand %p468_p10, %p465_p7 }
  0x1d   : > { %473 = shalt.err (!%p470_p9)
}
  0x1e   : > { %s474_s8 = scalar_lea.vmem %s140_s22, 16  ;;  %s481_s9 = scalar_lea.vmem %s140_s22, 32 }
  0x1f   : > { %p475_p1 = scmp.ne.s32.totalorder %s140_s22, %s474_s8  ;;  %p482_p6 = scmp.lt.s32.totalorder %s140_s22, %s140_s22 }
  0x20   : > { %p483_p4 = scmp.lt.s32.totalorder %s481_s9, %s474_s8 }
  0x21   : > { %p477_p2 = pnand %p475_p1, %p463_p3 }
  0x22   : > { %p484_p8 = por %p483_p4, %p482_p6 }
  0x23   : > { %p478_p13 = pneg %p477_p2 }
  0x25   : > { %p485_p12 = pnand %p484_p8, %p478_p13 }
  0x27   : > { %488 = shalt.err (!%p485_p12)
}
  0x28   : > { %406 = dma.hbm_to_vmem [thread:$0]  (!%p701_p11), %s891_s2, 16, %s140_s22, [#allocation6]  }
  0x29   : > { %p902_p1 = scmp.ne.s32.totalorder %s901_s26, 0  ;;  %p37_p2 = scmp.eq.s32.totalorder %s623_s15, 0 }
  0x2a   : > { %p903_p4 = scmp.ne.s32.totalorder %s619_s14, %s615_s13  ;;  %p904_p6 = scmp.eq.s32.totalorder %s670_s16, 1 }
  0x2b   : > { %s733_s17 = scalar_select %p902_p1, %s619_s14, %s29_s27  }
  0x2c   : > { %p741_p8 = por %p904_p6, %p903_p4  ;;  %p419_p9 = scmp.lt.s32.totalorder %s623_s15, 2 }
  0x2d   : > { %s150_s24 = sand.u32 1, %s619_s14   ;;  %p906_p12 = pmov %p903_p4 }
  0x2e   : > { %s905_s21 = scalar_select %p741_p8, 1, 0 }
  0x2f   : > { %p38_p13 = por %p37_p2, %p906_p12  ;;  %s750_s25 = sshll.u32 %s150_s24, 3 }
  0x30   : > { %s380_s28 = sshll.u32 %s623_s15, 7  ;;  %s154_s27 = scalar_lea.vmem [#allocation2], %s750_s25 }
  0x31   : > { %s756_s26 = scalar_lea.hbm %s889_s0, %s380_s28  ;;  %s161_s30 = sshll.u32 %s154_s27, 4  ;;  %s763_s30 = int_to_ptr.vmem [resolvable:$true] %s161_s30 }
  0x32   : > { %p759_p11 = pnand %p419_p9, %p38_p13  ;;  %s768_s7 = scalar_lea.hbm %s890_s1, %s380_s28 }
  0x33   : > { %s151_s8 = scalar_lea.sflag [#allocation3], %s150_s24  ;;  %s489_s9 = scalar_lea.hbm %s756_s26, 128 }
  0x34   : > { %p490_p0 = scmp.ne.s32.totalorder %s756_s26, %s489_s9  ;;  %p491_p3 = pneg %p759_p11 }
  0x35   : > { %s494_s29 = scalar_lea.hbm %s889_s0, 256  ;;  %p495_p10 = scmp.lt.u32.totalorder %s756_s26, %s889_s0 }
  0x36   : > { %p492_p5 = pnand %p491_p3, %p490_p0  ;;  %p496_p1 = scmp.lt.u32.totalorder %s494_s29, %s489_s9 }
  0x37   : > { %p498_p4 = scmp.lt.u32.totalorder %s489_s9, %s756_s26 }
  0x38   : > { %p493_p7 = pneg %p492_p5  ;;  %p497_p2 = por %p496_p1, %p495_p10 }
  0x3a   : > { %p499_p6 = por %p498_p4, %p497_p2 }
  0x3c   : > { %p500_p9 = pnand %p499_p6, %p493_p7 }
  0x3e   : > { %503 = shalt.err (!%p500_p9)
}
  0x3f   : > { %s504_s24 = scalar_lea.vmem %s763_s30, 128  ;;  %s626_s28 = smov [#allocation2]  }
  0x40   : > { %p505_p12 = scmp.ne.s32.totalorder %s763_s30, %s504_s24  ;;  %s509_s5 = sshll.u32 %s626_s28, 4  ;;  %s510_s5 = int_to_ptr.vmem [resolvable:$false] %s509_s5 }
  0x41   : > { %s511_s6 = scalar_lea.vmem %s510_s5, 256  ;;  %p512_p5 = scmp.lt.s32.totalorder %s763_s30, %s510_s5 }
  0x42   : > { %p507_p13 = pnand %p505_p12, %p491_p3  ;;  %p513_p10 = scmp.lt.s32.totalorder %s511_s6, %s504_s24 }
  0x44   : > { %p508_p0 = pneg %p507_p13  ;;  %p514_p1 = por %p513_p10, %p512_p5 }
  0x46   : > { %p515_p2 = pnand %p514_p1, %p508_p0 }
  0x48   : > { %518 = shalt.err (!%p515_p2)
}
  0x49   : > { %410 = dma.hbm_to_vmem [thread:$0]  (!%p759_p11), %s756_s26, 128, %s763_s30, %s151_s8  }
  0x4a   : > { %s168_s9 = sand.u32 1, %s623_s15   ;;  %s172_s10 = scalar_lea.vmem [#allocation5], %s750_s25 }
  0x4b   : > { %s179_s11 = sshll.u32 %s172_s10, 4  ;;  %s169_s29 = scalar_lea.sflag [#allocation6], %s168_s9  ;;  %s180_s11 = int_to_ptr.vmem [resolvable:$true] %s179_s11 }
  0x4c   : > { %s519_s22 = scalar_lea.hbm %s768_s7, 128  ;;  %s524_s28 = scalar_lea.hbm %s890_s1, 256 }
  0x4d   : > { %p520_p7 = scmp.ne.s32.totalorder %s768_s7, %s519_s22  ;;  %p525_p9 = scmp.lt.u32.totalorder %s768_s7, %s890_s1 }
  0x4e   : > { %p526_p12 = scmp.lt.u32.totalorder %s524_s28, %s519_s22  ;;  %p528_p0 = scmp.lt.u32.totalorder %s519_s22, %s768_s7 }
  0x4f   : > { %p522_p4 = pnand %p520_p7, %p491_p3 }
  0x50   : > { %p527_p13 = por %p526_p12, %p525_p9 }
  0x51   : > { %p523_p6 = pneg %p522_p4 }
  0x52   : > { %p529_p5 = por %p528_p0, %p527_p13 }
  0x54   : > { %p530_p10 = pnand %p529_p5, %p523_p6 }
  0x56   : > { %533 = shalt.err (!%p530_p10)
}
  0x57   : > { %s534_s25 = scalar_lea.vmem %s180_s11, 128  ;;  %s627_s26 = smov [#allocation5]  }
  0x58   : > { %p535_p1 = scmp.ne.s32.totalorder %s180_s11, %s534_s25  ;;  %s539_s30 = sshll.u32 %s627_s26, 4  ;;  %s540_s30 = int_to_ptr.vmem [resolvable:$false] %s539_s30 }
  0x59   : > { %s541_s8 = scalar_lea.vmem %s540_s30, 256  ;;  %p542_p4 = scmp.lt.s32.totalorder %s180_s11, %s540_s30 }
  0x5a   : > { %p537_p2 = pnand %p535_p1, %p491_p3  ;;  %p543_p8 = scmp.lt.s32.totalorder %s541_s8, %s534_s25 }
  0x5c   : > { %p538_p7 = pneg %p537_p2  ;;  %p544_p9 = por %p543_p8, %p542_p4 }
  0x5e   : > { %p545_p12 = pnand %p544_p9, %p538_p7 }
  0x60   : > { %548 = shalt.err (!%p545_p12)
}
  0x61   : > { %413 = dma.hbm_to_vmem [thread:$0]  (!%p759_p11), %s768_s7, 128, %s180_s11, %s169_s29  }
  0x62   : > { %p908_p6 = scmp.ne.s32.totalorder %s899_s20, 0 }
  0x63   : > { %s819_s9 = sand.u32 (!%p908_p6), 1, %s615_s13   ;;  %p909_p8 = scmp.ne.s32.totalorder (!%p908_p6), %s897_s18, 0 }
  0x64   : > { %188 = sbr.rel (%p908_p6) target bundleno = 322 (0x142), region = 32  ;;  %s822_s10 = sshll.u32 (!%p908_p6), %s819_s9, 3 }
  0x65   : > { %s191_s22 = scalar_lea.sflag (!%p908_p6), [#allocation3], %s819_s9  ;;  %s194_s27 = scalar_lea.vmem (!%p908_p6), [#allocation2], %s822_s10 }
  0x6b   : > { %594 = dma.done.wait (%p909_p8), %s191_s22, 128  }
  0x6c   : > { %596 = vsyncadd (%p909_p8), %s191_s22, 4294967168  ;;  %s199_s20 = sand.u32 1, %s670_s16   ;;  %s203_s7 = scalar_lea.vmem [#allocation5], %s822_s10 }
  0x6d   : > { %s200_s4 = scalar_lea.sflag [#allocation6], %s199_s20 }
  0x6e   : > { %598 = dma.done.wait (%p909_p8), %s200_s4, 128  }
  0x6f   : > { %600 = vsyncadd (%p909_p8), %s200_s4, 4294967168  ;;  %p910_p11 = scmp.eq.s32.totalorder %s670_s16, 0 }
  0x71   : > { %602 = dma.done.wait (%p910_p11), [#allocation6], 16   ;;  %p911_p3 = pmov %p910_p11 }
  0x72   : > { %v236_v0 = vld [vmem:[%s203_s7] sm:$0xff]  ;;  %v235_v5 = vld [vmem:[%s194_s27] sm:$0xff]  ;;  %s390_s18 = sshll.u32 %s670_s16, 7  ;;  %s234_s11 = scalar_lea.vmem [#allocation8], %s822_s10 }
  0x73   : > { %604 = vsyncadd (%p911_p3), [#allocation6], 4294967280  ;;  %v238_v1 = vsub.f32 0.0, %v236_v0  ;;  %v388_v13 = vld [vmem:[#allocation7] ss:$0 sm:$0xff]  ;;  %s273_s29 = sshll.u32 %s234_s11, 4  ;;  %s845_s5 = scalar_lea.hbm %s892_s3, %s390_s18  ;;  %s847_s29 = int_to_ptr.vmem [resolvable:$true] %s273_s29 }
  0x74   : > { %s260_s6 = scalar_lea.sflag [#allocation4], %s819_s9  ;;  %s549_s25 = scalar_lea.vmem %s847_s29, 128 }
  0x75   : > { %v239_v2 = vmul.f32 1.442695, %v238_v1  ;;  %p550_p13 = scmp.ne.s32.totalorder %s847_s29, %s549_s25  ;;  %p912_p0 = scmp.ne.s32.totalorder %s905_s21, 0 }
  0x76   : > { %s628_s16 = smov [#allocation8]  }
  0x77   : > { %455 = vpow2.f32 %v239_v2  ;;  %p551_p5 = pnand %p550_p13, %p912_p0  ;;  %s553_s26 = sshll.u32 %s628_s16, 4  ;;  %s554_s26 = int_to_ptr.vmem [resolvable:$false] %s553_s26 }
  0x78   : > { %s555_s30 = scalar_lea.vmem %s554_s26, 256  ;;  %p556_p1 = scmp.lt.s32.totalorder %s847_s29, %s554_s26 }
  0x79   : > { %p552_p10 = pneg %p551_p5  ;;  %p557_p2 = scmp.lt.s32.totalorder %s555_s30, %s549_s25 }
  0x7b   : > { %p558_p7 = por %p557_p2, %p556_p1 }
  0x7d   : > { %p559_p4 = pnand %p558_p7, %p552_p10 }
  0x81   : > { %v456_v3 = vpop.eup %455 }
  0x82   : > { %v241_v4 = vadd.f32 1.0, %v456_v3 }
  0x84   : > { %457 = vrcp.f32 %v241_v4 }
  0x8e   : > { %v458_v6 = vpop.eup %457 }
  0x8f   : > { %v243_v7 = vmul.f32 %v458_v6, %v235_v5 }
  0x91   : > { %v244_v8 = vmul.f32 %v243_v7, %v243_v7 }
  0x93   : > { %245 = vadd.xlane.f32.xlu0 %v244_v8 }
 0x120   : > { %v246_v9 = vpop.xlane.xlu0 %245 }
 0x121   : > { %v247_v10 = vmul.f32 0.03125, %v246_v9 }
 0x123   : > { %v248_v11 = vadd.f32 1e-05, %v247_v10 }
 0x125   : > { %459 = vrsqrt.f32 %v248_v11 }
 0x12f   : > { %v460_v12 = vpop.eup %459 }
 0x130   : > { %v250_v14 = vmul.f32 %v460_v12, %v243_v7 }
 0x132   : > { %v257_v15 = vmul.f32 %v388_v13, %v250_v14 }
 0x134   : > { %258 = vst [vmem:[%s234_s11] sm:$0xff] %v257_v15 }
 0x135   : > { %562 = shalt.err (!%p559_p4)
}
 0x136   : > { %s563_s8 = scalar_lea.hbm %s845_s5, 128  ;;  %s567_s22 = scalar_lea.hbm %s892_s3, 256 }
 0x137   : > { %p564_p9 = scmp.ne.s32.totalorder %s845_s5, %s563_s8  ;;  %p568_p8 = scmp.lt.u32.totalorder %s845_s5, %s892_s3 }
 0x138   : > { %p569_p11 = scmp.lt.u32.totalorder %s567_s22, %s563_s8  ;;  %p571_p13 = scmp.lt.u32.totalorder %s563_s8, %s845_s5 }
 0x139   : > { %p565_p12 = pnand %p564_p9, %p912_p0 }
 0x13a   : > { %p570_p3 = por %p569_p11, %p568_p8 }
 0x13b   : > { %p566_p6 = pneg %p565_p12 }
 0x13c   : > { %p572_p5 = por %p571_p13, %p570_p3 }
 0x13e   : > { %p573_p10 = pnand %p572_p5, %p566_p6 }
 0x140   : > { %576 = shalt.err (!%p573_p10)
}
 0x141   : > { %401 = dma.vmem_to_hbm [thread:$0]  (%p912_p0), %s847_s29, 128, %s845_s5, %s260_s6  }
 0x142 PF: > { %s285_s4 = sand.u32 1, %s611_s12   ;;  %p913_p1 = scmp.ne.s32.totalorder %s898_s19, 0 }
 0x143   : > { %p914_p2 = scmp.ge.s32.totalorder %s623_s15, 2  ;;  %s286_s7 = scalar_lea.sflag [#allocation4], %s285_s4 }
 0x145   : > { %p415_p7 = pnand %p914_p2, %p913_p1 }
 0x147   : > { %606 = dma.done.wait (!%p415_p7), %s286_s7, 128  }
 0x148   : > { %608 = vsyncadd (!%p415_p7), %s286_s7, 4294967168  ;;  %p19_p4 = scmp.ge.s32.totalorder %s697_s23, 4   ;;  %s915_s12 = smov %s615_s13 }
 0x149   : > { %s916_s13 = smov %s619_s14  ;;  %s917_s14 = smov %s733_s17 }
 0x14a   : > { %s918_s15 = smov %s697_s23  ;;  %21 = sbr.rel (!%p19_p4) target bundleno = 7 (0x7), region = 94 }
 0x151   :  { %291 = vsyncpa [#allocation3], 1 }
 0x152   :  { %293 = vsyncpa [#allocation3 + $0x1], 1 }
 0x153   :  { %294 = vsyncpa [#allocation6], 1 }
 0x154   :  { %296 = vsyncpa [#allocation6 + $0x1], 1 }
 0x155   :  { %297 = vsyncpa [#allocation4], 1 }
 0x156   :  { %299 = vsyncpa [#allocation4 + $0x1], 1 }

</bundles_post_ra>
